<compile_context>
chip_gen: v5e
topology: v5e:2x2
jax: 0.10.0
libtpu: 0.0.40
codegen_flags: <defaults>
</compile_context>

<pallas_src>
import jax
import jax.numpy as jnp
from jax.experimental import pallas as pl
from jax.experimental.pallas import tpu as pltpu

LANE = 128      # TPU lane width (last dim)
SUBLANE = 8     # fp32 sublane granularity (second-to-last dim)
MAX_TILE_B = 256


def _round_up(x, m):
    return (x + m - 1) // m * m


def _leaky_relu(x, slope=0.01):
    return jnp.where(x > 0, x, slope * x)


# ----------------------------------------------------------------------------
# Pallas kernel: fused 3-layer MLP on one (TILE_B, *) batch tile.
# Matmul operands are bf16 (MXU-friendly on v6e/v7x); accumulation and the
# bias-add / LeakyReLU elementwise work stay in fp32 (v5e VPU has no bf16).
# ----------------------------------------------------------------------------
def _mlp3_kernel(x_ref, w1_ref, b1_ref, w2_ref, b2_ref, w3_ref, b3_ref, o_ref):
    h = jnp.dot(x_ref[...], w1_ref[...], preferred_element_type=jnp.float32)
    h = _leaky_relu(h + b1_ref[...])
    h = jnp.dot(h.astype(w2_ref.dtype), w2_ref[...],
                preferred_element_type=jnp.float32)
    h = _leaky_relu(h + b2_ref[...])
    o = jnp.dot(h.astype(w3_ref.dtype), w3_ref[...],
                preferred_element_type=jnp.float32)
    o_ref[...] = (o + b3_ref[...]).astype(o_ref.dtype)


def _mlp3_padded(x_pad, p, *, tile_b):
    """x_pad: (B_pad, Din_pad) bf16 with B_pad % tile_b == 0 and Din_pad % 128 == 0.
    p: dict of padded bf16 weights (Din_pad, Dout_pad) and fp32 biases (1, Dout_pad).
    Returns (B_pad, Dout_pad) fp32 (lane-dense slab)."""
    B_pad, din_p = x_pad.shape
    dout_p = p["w3"].shape[1]
    grid = (B_pad // tile_b,)

    def batch_spec(d):
        return pl.BlockSpec((tile_b, d), lambda i: (i, 0))

    def const_spec(a):
        # Full array each step; constant index_map keeps it VMEM-resident.
        return pl.BlockSpec(a.shape, lambda i: (0, 0))

    return pl.pallas_call(
        _mlp3_kernel,
        out_shape=jax.ShapeDtypeStruct((B_pad, dout_p), jnp.float32),
        grid=grid,
        in_specs=[batch_spec(din_p),
                  const_spec(p["w1"]), const_spec(p["b1"]),
                  const_spec(p["w2"]), const_spec(p["b2"]),
                  const_spec(p["w3"]), const_spec(p["b3"])],
        out_specs=batch_spec(dout_p),
        compiler_params=pltpu.CompilerParams(
            dimension_semantics=("parallel",),      # batch tiles independent
            vmem_limit_bytes=32 * 1024 * 1024,      # well under v7x's 64 MiB
        ),
    )(x_pad, p["w1"], p["b1"], p["w2"], p["b2"], p["w3"], p["b3"])


# ----------------------------------------------------------------------------
# Parameter preparation: zero-pad to lane multiples, cast weights to bf16.
# ----------------------------------------------------------------------------
def _prepare_mlp_params(raw):
    prep = {}
    for i in (1, 2, 3):
        w = raw[f"w{i}"]
        b = raw[f"b{i}"].reshape(1, -1)
        din, dout = w.shape
        din_p, dout_p = _round_up(din, LANE), _round_up(dout, LANE)
        w_p = jnp.zeros((din_p, dout_p), jnp.float32).at[:din, :dout].set(w)
        b_p = jnp.zeros((1, dout_p), jnp.float32).at[:, :dout].set(b)
        prep[f"w{i}"] = w_p.astype(jnp.bfloat16)   # MXU operands in bf16
        prep[f"b{i}"] = b_p                        # fp32 elementwise path
    return prep


# ----------------------------------------------------------------------------
# Autoencoder wrapper (mirrors the PyTorch class semantics)
# ----------------------------------------------------------------------------
class Autoencoder:
    """Unsupervised Wasserstein Autoencoder (JAX/Pallas version).

    encoder / decoder are parameter pytrees; forward(z) == decode(z)."""

    def __init__(self, encoder_params, decoder_params, channels, spatial,
                 max_tile_b=MAX_TILE_B):
        self._enc = _prepare_mlp_params(encoder_params)
        self._dec = _prepare_mlp_params(decoder_params)
        self._enc_dims = (encoder_params["w1"].shape[0],
                          encoder_params["w3"].shape[1])
        self._dec_dims = (decoder_params["w1"].shape[0],
                          decoder_params["w3"].shape[1])
        self.channels = channels
        self.spatial = spatial
        self.max_tile_b = max_tile_b

    def _run(self, x2d, prep, din, dout):
        B = x2d.shape[0]
        tile_b = min(self.max_tile_b, _round_up(B, SUBLANE))
        B_pad = _round_up(B, tile_b)
        din_p = prep["w1"].shape[0]
        x_pad = jnp.zeros((B_pad, din_p), jnp.float32).at[:B, :din].set(x2d)
        out_pad = _mlp3_padded(x_pad.astype(jnp.bfloat16), prep, tile_b=tile_b)
        return out_pad[:B, :dout]           # slice lane-dense slab in wrapper

    def encode(self, x):
        # x: (B, C, S) channels-first -> flatten -> latent (B, L)
        B = x.shape[0]
        flat = x.reshape(B, self.channels * self.spatial)
        din, dout = self._enc_dims
        return self._run(flat, self._enc, din, dout)

    def decode(self, z):
        # z: (B, L) -> (B, C, S) channels-first (PyTorch NCW convention)
        din, dout = self._dec_dims
        flat = self._run(z, self._dec, din, dout)
        return flat.reshape(z.shape[0], self.channels, self.spatial)

    def __call__(self, z):
        """Forward pass: decoder only, matching the PyTorch module."""
        return self.decode(z)


# ----------------------------------------------------------------------------
# Deterministic parameter initialization (nonzero biases so the bias-add path
# inside the kernel is actually exercised by the sanity check).
# ----------------------------------------------------------------------------
def _init_mlp_params(key, dims):
    n_layers = len(dims) - 1
    ks = jax.random.split(key, 2 * n_layers)
    params = {}
    for i, (din, dout) in enumerate(zip(dims[:-1], dims[1:]), start=1):
        scale = 1.0 / jnp.sqrt(jnp.float32(din))
        params[f"w{i}"] = (jax.random.normal(ks[2 * (i - 1)], (din, dout),
                                             dtype=jnp.float32) * scale)
        params[f"b{i}"] = (jax.random.normal(ks[2 * (i - 1) + 1], (dout,),
                                             dtype=jnp.float32) * 0.1)
    return params


# ----------------------------------------------------------------------------
# Main
# ----------------------------------------------------------------------------
if __name__ == "__main__":
    # Small, module-consistent shapes (padded internally to TPU granularity).
    BATCH = 2
    CHANNELS = 4
    SPATIAL = 16
    LATENT = 8
    HIDDEN = 32
    OUT = CHANNELS * SPATIAL  # 64

    root = jax.random.PRNGKey(0)
    k_enc, k_dec, k_z = jax.random.split(root, 3)

    encoder_params = _init_mlp_params(k_enc, [OUT, HIDDEN, HIDDEN, LATENT])
    decoder_params = _init_mlp_params(k_dec, [LATENT, HIDDEN, HIDDEN, OUT])

    model = Autoencoder(encoder_params, decoder_params, CHANNELS, SPATIAL)

    # Latent input z, since forward(z) = decoder(z).
    z = jax.random.normal(k_z, (BATCH, LATENT), dtype=jnp.float32)

    out = jax.block_until_ready(model(z))

    # Pure-JAX reference of the same decoder, mimicking the bf16 operand casts
    # (fp32 accumulate), so the comparison is tight.
    def ref_decode(zz, p):
        bf = lambda a: a.astype(jnp.bfloat16).astype(jnp.float32)
        h = _leaky_relu(bf(zz) @ bf(p["w1"]) + p["b1"].reshape(1, -1))
        h = _leaky_relu(bf(h) @ bf(p["w2"]) + p["b2"].reshape(1, -1))
        o = bf(h) @ bf(p["w3"]) + p["b3"].reshape(1, -1)
        return o.reshape(zz.shape[0], CHANNELS, SPATIAL)

    ref = ref_decode(z, decoder_params)
    assert out.shape == (BATCH, CHANNELS, SPATIAL)
    err = float(jnp.max(jnp.abs(out - ref)))
    assert jnp.allclose(out, ref, atol=1e-2, rtol=1e-2), f"max abs err {err}"

    print("KERNEL_OK")
</pallas_src>

<mosaic_0001>
module attributes {stable_mosaic.version = 11 : i64} {
  func.func @_mlp3_kernel(%arg0: i32, %arg1: memref<8x128xbf16, #tpu.memory_space<vmem>>, %arg2: memref<128x128xbf16, #tpu.memory_space<vmem>>, %arg3: memref<1x128xf32, #tpu.memory_space<vmem>>, %arg4: memref<128x128xbf16, #tpu.memory_space<vmem>>, %arg5: memref<1x128xf32, #tpu.memory_space<vmem>>, %arg6: memref<128x128xbf16, #tpu.memory_space<vmem>>, %arg7: memref<1x128xf32, #tpu.memory_space<vmem>>, %arg8: memref<8x128xf32, #tpu.memory_space<vmem>>) attributes {dimension_semantics = [#tpu.dimension_semantics<parallel>], iteration_bounds = array<i64: 1>, scalar_prefetch = 0 : i64, scratch_operands = 0 : i64, tpu.core_type = #tpu.core_type<tc>, window_params = [{transform_indices = @transform_0, window_bounds = array<i64: 8, 128>}, {pipeline_mode = #tpu.pipeline_mode<synchronous>, transform_indices = @transform_1, window_bounds = array<i64: 128, 128>}, {pipeline_mode = #tpu.pipeline_mode<synchronous>, transform_indices = @transform_2, window_bounds = array<i64: 1, 128>}, {pipeline_mode = #tpu.pipeline_mode<synchronous>, transform_indices = @transform_3, window_bounds = array<i64: 128, 128>}, {pipeline_mode = #tpu.pipeline_mode<synchronous>, transform_indices = @transform_4, window_bounds = array<i64: 1, 128>}, {pipeline_mode = #tpu.pipeline_mode<synchronous>, transform_indices = @transform_5, window_bounds = array<i64: 128, 128>}, {pipeline_mode = #tpu.pipeline_mode<synchronous>, transform_indices = @transform_6, window_bounds = array<i64: 1, 128>}, {transform_indices = @transform_7, window_bounds = array<i64: 8, 128>}]} {
    %c0 = arith.constant 0 : index
    %c0_0 = arith.constant 0 : index
    %0 = vector.load %arg1[%c0, %c0_0] : memref<8x128xbf16, #tpu.memory_space<vmem>>, vector<8x128xbf16>
    %c0_1 = arith.constant 0 : index
    %c0_2 = arith.constant 0 : index
    %1 = vector.load %arg2[%c0_1, %c0_2] : memref<128x128xbf16, #tpu.memory_space<vmem>>, vector<128x128xbf16>
    %cst = arith.constant dense<0.000000e+00> : vector<8x128xf32>
    %2 = tpu.matmul %0, %1, %cst {dimension_numbers = #tpu.dot_dimension_numbers<[1], [0], [0], [1], [0, 0, 1, 1], [], []>} : vector<8x128xbf16>, vector<128x128xbf16>, vector<8x128xf32> -> vector<8x128xf32>
    %c0_3 = arith.constant 0 : index
    %c0_4 = arith.constant 0 : index
    %3 = vector.load %arg3[%c0_3, %c0_4] : memref<1x128xf32, #tpu.memory_space<vmem>>, vector<1x128xf32>
    %4 = vector.broadcast %3 : vector<1x128xf32> to vector<8x128xf32>
    %5 = arith.addf %2, %4 : vector<8x128xf32>
    %cst_5 = arith.constant 0.000000e+00 : f32
    %6 = vector.broadcast %cst_5 : f32 to vector<8x128xf32>
    %7 = arith.cmpf ogt, %5, %6 : vector<8x128xf32>
    %cst_6 = arith.constant 0.00999999977 : f32
    %8 = vector.broadcast %cst_6 : f32 to vector<8x128xf32>
    %9 = arith.mulf %8, %5 : vector<8x128xf32>
    %10 = arith.select %7, %5, %9 : vector<8x128xi1>, vector<8x128xf32>
    %11 = arith.truncf %10 : vector<8x128xf32> to vector<8x128xbf16>
    %c0_7 = arith.constant 0 : index
    %c0_8 = arith.constant 0 : index
    %12 = vector.load %arg4[%c0_7, %c0_8] : memref<128x128xbf16, #tpu.memory_space<vmem>>, vector<128x128xbf16>
    %cst_9 = arith.constant dense<0.000000e+00> : vector<8x128xf32>
    %13 = tpu.matmul %11, %12, %cst_9 {dimension_numbers = #tpu.dot_dimension_numbers<[1], [0], [0], [1], [0, 0, 1, 1], [], []>} : vector<8x128xbf16>, vector<128x128xbf16>, vector<8x128xf32> -> vector<8x128xf32>
    %c0_10 = arith.constant 0 : index
    %c0_11 = arith.constant 0 : index
    %14 = vector.load %arg5[%c0_10, %c0_11] : memref<1x128xf32, #tpu.memory_space<vmem>>, vector<1x128xf32>
    %15 = vector.broadcast %14 : vector<1x128xf32> to vector<8x128xf32>
    %16 = arith.addf %13, %15 : vector<8x128xf32>
    %cst_12 = arith.constant 0.000000e+00 : f32
    %17 = vector.broadcast %cst_12 : f32 to vector<8x128xf32>
    %18 = arith.cmpf ogt, %16, %17 : vector<8x128xf32>
    %cst_13 = arith.constant 0.00999999977 : f32
    %19 = vector.broadcast %cst_13 : f32 to vector<8x128xf32>
    %20 = arith.mulf %19, %16 : vector<8x128xf32>
    %21 = arith.select %18, %16, %20 : vector<8x128xi1>, vector<8x128xf32>
    %22 = arith.truncf %21 : vector<8x128xf32> to vector<8x128xbf16>
    %c0_14 = arith.constant 0 : index
    %c0_15 = arith.constant 0 : index
    %23 = vector.load %arg6[%c0_14, %c0_15] : memref<128x128xbf16, #tpu.memory_space<vmem>>, vector<128x128xbf16>
    %cst_16 = arith.constant dense<0.000000e+00> : vector<8x128xf32>
    %24 = tpu.matmul %22, %23, %cst_16 {dimension_numbers = #tpu.dot_dimension_numbers<[1], [0], [0], [1], [0, 0, 1, 1], [], []>} : vector<8x128xbf16>, vector<128x128xbf16>, vector<8x128xf32> -> vector<8x128xf32>
    %c0_17 = arith.constant 0 : index
    %c0_18 = arith.constant 0 : index
    %25 = vector.load %arg7[%c0_17, %c0_18] : memref<1x128xf32, #tpu.memory_space<vmem>>, vector<1x128xf32>
    %26 = vector.broadcast %25 : vector<1x128xf32> to vector<8x128xf32>
    %27 = arith.addf %24, %26 : vector<8x128xf32>
    %c0_19 = arith.constant 0 : index
    %c0_20 = arith.constant 0 : index
    %28 = vector.load %arg8[%c0_19, %c0_20] : memref<8x128xf32, #tpu.memory_space<vmem>>, vector<8x128xf32>
    tpu.vector_store %arg8[%c0_19, %c0_20], %27 {strides = array<i32>} : memref<8x128xf32, #tpu.memory_space<vmem>>, vector<8x128xf32>,
    return
  }
  func.func @transform_0(%arg0: i32) -> (i32, i32) {
    %c0_i32 = arith.constant 0 : i32
    %c0_i32_0 = arith.constant 0 : i32
    return %arg0, %c0_i32 : i32, i32
  }
  func.func @transform_1(%arg0: i32) -> (i32, i32) {
    %c0_i32 = arith.constant 0 : i32
    %c0_i32_0 = arith.constant 0 : i32
    %c0_i32_1 = arith.constant 0 : i32
    return %c0_i32, %c0_i32_0 : i32, i32
  }
  func.func @transform_2(%arg0: i32) -> (i32, i32) {
    %c0_i32 = arith.constant 0 : i32
    %c0_i32_0 = arith.constant 0 : i32
    %c0_i32_1 = arith.constant 0 : i32
    return %c0_i32, %c0_i32_0 : i32, i32
  }
  func.func @transform_3(%arg0: i32) -> (i32, i32) {
    %c0_i32 = arith.constant 0 : i32
    %c0_i32_0 = arith.constant 0 : i32
    %c0_i32_1 = arith.constant 0 : i32
    return %c0_i32, %c0_i32_0 : i32, i32
  }
  func.func @transform_4(%arg0: i32) -> (i32, i32) {
    %c0_i32 = arith.constant 0 : i32
    %c0_i32_0 = arith.constant 0 : i32
    %c0_i32_1 = arith.constant 0 : i32
    return %c0_i32, %c0_i32_0 : i32, i32
  }
  func.func @transform_5(%arg0: i32) -> (i32, i32) {
    %c0_i32 = arith.constant 0 : i32
    %c0_i32_0 = arith.constant 0 : i32
    %c0_i32_1 = arith.constant 0 : i32
    return %c0_i32, %c0_i32_0 : i32, i32
  }
  func.func @transform_6(%arg0: i32) -> (i32, i32) {
    %c0_i32 = arith.constant 0 : i32
    %c0_i32_0 = arith.constant 0 : i32
    %c0_i32_1 = arith.constant 0 : i32
    return %c0_i32, %c0_i32_0 : i32, i32
  }
  func.func @transform_7(%arg0: i32) -> (i32, i32) {
    %c0_i32 = arith.constant 0 : i32
    %c0_i32_0 = arith.constant 0 : i32
    return %arg0, %c0_i32 : i32, i32
  }
}

</mosaic_0001>

<bundles_post_ra>
// kernel: tpu_custom_call.1
= control target key start
LH: loop header
LB: loop body
LE: loop exit
PB: predicated region body
PF: predicated region fallthrough
CT: control target
= control target key end

     0   :  { %12 = vsyncpa [#allocation3], 0  ;;  %s689_s0 = inlined_call_operand.hbm [shape: bf16[8,128], index: 0, kind: input, shape index: {}]   ;;  %s690_s1 = inlined_call_operand.hbm [shape: bf16[128,128], index: 1, kind: input, shape index: {}]   ;;  %s691_s2 = inlined_call_operand.vmem [shape: f32[1,128], index: 2, kind: input, shape index: {}]   ;;  %s692_s3 = inlined_call_operand.hbm [shape: bf16[128,128], index: 3, kind: input, shape index: {}]   ;;  %s693_s4 = inlined_call_operand.vmem [shape: f32[1,128], index: 4, kind: input, shape index: {}]   ;;  %s694_s5 = inlined_call_operand.hbm [shape: bf16[128,128], index: 5, kind: input, shape index: {}]   ;;  %s695_s6 = inlined_call_operand.vmem [shape: f32[1,128], index: 6, kind: input, shape index: {}]   ;;  %s696_s7 = inlined_call_operand.hbm [shape: f32[8,128], index: 7, kind: output, shape index: {}]  }
   0x1   :  { %13 = vsyncpa [#allocation6], 0 }
   0x2   :  { %14 = vsyncpa [#allocation9], 0  ;;  %s31_s26 = sshll.u32 %s690_s1, 4  ;;  %s32_s26 = int_to_ptr.hbm [resolvable:$true] %s31_s26 }
   0x3   :  { %15 = vsyncpa [#allocation4], 0  ;;  %s618_s27 = smov [#allocation5]   ;;  %s21_s8 = sshll.u32 %s689_s0, 4  ;;  %s22_s8 = int_to_ptr.hbm [resolvable:$true] %s21_s8 }
   0x4   :  { %s33_s28 = sshll.u32 %s618_s27, 4  ;;  %s619_s9 = smov 64   ;;  %s34_s28 = int_to_ptr.vmem [resolvable:$true] %s33_s28 }
   0x5   :  { %s620_s10 = smov 4   ;;  %s621_s11 = smov [#allocation2]  }
   0x6   :  { %39 = dma.hbm_to_vmem [thread:$0]  %s32_s26, 1024, %s34_s28, [#allocation6], %s619_s9, %s619_s9, %s620_s10  }
   0x7   :  { %s23_s12 = sshll.u32 %s621_s11, 4  ;;  %s46_s15 = sshll.u32 %s692_s3, 4  ;;  %s24_s12 = int_to_ptr.vmem [resolvable:$true] %s23_s12  ;;  %s47_s15 = int_to_ptr.hbm [resolvable:$true] %s46_s15 }
   0x8   :  { %26 = dma.hbm_to_vmem [thread:$0]  %s22_s8, 64, %s24_s12, [#allocation3]  }
   0x9   :  { %s61_s17 = sshll.u32 %s694_s5, 4  ;;  %s622_s18 = smov [#allocation7]   ;;  %s62_s17 = int_to_ptr.hbm [resolvable:$true] %s61_s17 }
   0xa   :  { %s48_s19 = sshll.u32 %s622_s18, 4  ;;  %s623_s0 = smov [#allocation8]   ;;  %s49_s19 = int_to_ptr.vmem [resolvable:$true] %s48_s19 }
   0xb   :  { %54 = dma.hbm_to_vmem [thread:$0]  %s47_s15, 1024, %s49_s19, [#allocation6], %s619_s9, %s619_s9, %s620_s10  }
   0xc   :  { %s63_s20 = sshll.u32 %s623_s0, 4  ;;  %s64_s20 = int_to_ptr.vmem [resolvable:$true] %s63_s20 }
   0xd   :  { %69 = dma.hbm_to_vmem [thread:$0]  %s62_s17, 1024, %s64_s20, [#allocation9], %s619_s9, %s619_s9, %s620_s10  }
   0xe   :  { %610 = dma.done.wait [#allocation3], 64  }
   0xf   :  { %611 = vsyncadd [#allocation3], 4294967232 }
  0x10   :  { %612 = dma.done.wait [#allocation6], 2048  }
  0x11   :  { %613 = vsyncadd [#allocation6], 4294965248 }
  0x12   :  { %614 = dma.done.wait [#allocation9], 1024  }
  0x13   :  { %615 = vsyncadd [#allocation9], 4294966272  ;;  %v463_v0 = vld [vmem:[#allocation5 + $0x38] sm:$0xff]  ;;  %v462_v1 = vld [vmem:[#allocation5 + $0x30] sm:$0xff]  ;;  %s624_s24 = smov [#allocation10]   ;;  %s348_s28 = sshll.u32 %s696_s7, 4  ;;  %s349_s28 = int_to_ptr.hbm [resolvable:$true] %s348_s28 }
  0x14   :  { %157 = vmatpush.bf16.msra.mxu0 %v463_v0  ;;  %v471_v2 = vld [vmem:[#allocation7 + $0x38] sm:$0xff]  ;;  %v470_v3 = vld [vmem:[#allocation7 + $0x30] sm:$0xff]  ;;  %v461_v4 = vld [vmem:[#allocation5 + $0x28] sm:$0xff]  ;;  %s346_s25 = sshll.u32 %s624_s24, 4  ;;  %s347_s25 = int_to_ptr.vmem [resolvable:$true] %s346_s25 }
  0x15   :  { %242 = vmatpush.bf16.msra.mxu1 %v471_v2  ;;  %v469_v5 = vld [vmem:[#allocation7 + $0x28] sm:$0xff]  ;;  %v460_v6 = vld [vmem:[#allocation5 + $0x20] sm:$0xff]  ;;  %v459_v8 = vld [vmem:[#allocation5 + $0x18] sm:$0xff] }
  0x16   :  { %v468_v7 = vld [vmem:[#allocation7 + $0x20] sm:$0xff]  ;;  %v467_v9 = vld [vmem:[#allocation7 + $0x18] sm:$0xff]  ;;  %v458_v10 = vld [vmem:[#allocation5 + $0x10] sm:$0xff] }
  0x17   :  { %v466_v11 = vld [vmem:[#allocation7 + $0x10] sm:$0xff]  ;;  %v457_v12 = vld [vmem:[#allocation5 + $0x8] sm:$0xff]  ;;  %v456_v13 = vld [vmem:[#allocation5] sm:$0xff] }
  0x18   :  { %158 = vmatpush.bf16.msra.mxu0 %v462_v1  ;;  %v88_v14 = vld [vmem:[#allocation2] sm:$0xf]  ;;  %v465_v15 = vld [vmem:[#allocation7 + $0x8] sm:$0xff]  ;;  %v464_v16 = vld [vmem:[#allocation7] sm:$0xff] }
  0x19   :  { %243 = vmatpush.bf16.msra.mxu1 %v470_v3  ;;  %v479_v17 = vld [vmem:[#allocation8 + $0x38] sm:$0xff]  ;;  %v478_v18 = vld [vmem:[#allocation8 + $0x30] sm:$0xff]  ;;  %v477_v19 = vld [vmem:[#allocation8 + $0x28] sm:$0xff] }
  0x1a   :  { %327 = vmatpush.bf16.msra.mxu2 %v479_v17  ;;  %v476_v20 = vld [vmem:[#allocation8 + $0x20] sm:$0xff]  ;;  %v475_v21 = vld [vmem:[#allocation8 + $0x18] sm:$0xff]  ;;  %v474_v22 = vld [vmem:[#allocation8 + $0x10] sm:$0xff] }
  0x1b   :  { %v487_v23 = vld [vmem:[%s691_s2] ss:$0 sm:$0xff]  ;;  %v473_v30 = vld [vmem:[#allocation8 + $0x8] sm:$0xff]  ;;  %v472_v31 = vld [vmem:[#allocation8] sm:$0xff] }
  0x1c   :  { %159 = vmatpush.bf16.msra.mxu0 %v461_v4  ;;  %v488_v32 = vld [vmem:[%s693_s4] ss:$0 sm:$0xff] }
  0x1d   :  { %244 = vmatpush.bf16.msra.mxu1 %v469_v5  ;;  %v489_v39 = vld [vmem:[%s695_s6] ss:$0 sm:$0xff] }
  0x1e   :  { %328 = vmatpush.bf16.msra.mxu2 %v478_v18 }
  0x20   :  { %160 = vmatpush.bf16.msra.mxu0 %v460_v6 }
  0x21   :  { %245 = vmatpush.bf16.msra.mxu1 %v468_v7 }
  0x22   :  { %329 = vmatpush.bf16.msra.mxu2 %v477_v19 }
  0x24   :  { %161 = vmatpush.bf16.msra.mxu0 %v459_v8 }
  0x25   :  { %246 = vmatpush.bf16.msra.mxu1 %v467_v9 }
  0x26   :  { %330 = vmatpush.bf16.msra.mxu2 %v476_v20 }
  0x28   :  { %162 = vmatpush.bf16.msra.mxu0 %v458_v10 }
  0x29   :  { %247 = vmatpush.bf16.msra.mxu1 %v466_v11 }
  0x2a   :  { %331 = vmatpush.bf16.msra.mxu2 %v475_v21 }
  0x2c   :  { %163 = vmatpush.bf16.msra.mxu0 %v457_v12 }
  0x2d   :  { %248 = vmatpush.bf16.msra.mxu1 %v465_v15 }
  0x2e   :  { %332 = vmatpush.bf16.msra.mxu2 %v474_v22 }
  0x30   :  { %164 = vmatpush.bf16.msra.mxu0 %v456_v13 }
  0x31   :  { %249 = vmatpush.bf16.msra.mxu1 %v464_v16 }
  0x32   :  { %333 = vmatpush.bf16.msra.mxu2 %v473_v30 }
  0x33   :  { %165 = vmatmul.bf16.vlgmr.msra.gmra.mxu0 %v88_v14 }
  0x36   :  { %334 = vmatpush.bf16.msra.mxu2 %v472_v31 }
  0xb0   :  { %v166_v24 = vpop.f32.mrf.mxu0 }
  0xb1   :  { %v167_v25 = vadd.f32 %v487_v23, %v166_v24 }
  0xb3   :  { %v171_v26 = vmul.f32 0.01, %v167_v25  ;;  %vm170_vm0 = vcmp.gt.f32.partialorder %v167_v25, 0.0 }
  0xb5   :  { %v172_v27 = vsel %vm170_vm0, %v167_v25, %v171_v26 }
  0xb6   :  { %v173_v28 = vpack.c.bf16 %v172_v27, %v172_v27 }
  0xb8   :  { %v168_v29 = vpop.f32.mrf.mxu0  ;;  %250 = vmatmul.bf16.vlgmr.msra.gmra.mxu1 %v173_v28 }
 0x135   :  { %v251_v33 = vpop.f32.mrf.mxu1 }
 0x136   :  { %v252_v34 = vadd.f32 %v488_v32, %v251_v33 }
 0x138   :  { %v256_v35 = vmul.f32 0.01, %v252_v34  ;;  %vm255_vm1 = vcmp.gt.f32.partialorder %v252_v34, 0.0 }
 0x13a   :  { %v257_v36 = vsel %vm255_vm1, %v252_v34, %v256_v35 }
 0x13b   :  { %v258_v37 = vpack.c.bf16 %v257_v36, %v257_v36 }
 0x13d   :  { %v253_v38 = vpop.f32.mrf.mxu1  ;;  %335 = vmatmul.bf16.vlgmr.msra.gmra.mxu2 %v258_v37 }
 0x1c0   :  { %v336_v40 = vpop.f32.mrf.mxu2 }
 0x1c1   :  { %v337_v41 = vadd.f32 %v489_v39, %v336_v40 }
 0x1c3   :  { %340 = vst [vmem:[#allocation10] sm:$0xff] %v337_v41 }
 0x1c4   :  { %351 = dma.vmem_to_hbm [thread:$0]  %s347_s25, 128, %s349_s28, [#allocation4]  }
 0x1c8   :  { %v338_v42 = vpop.f32.mrf.mxu2 }
 0x1c9   :  { %616 = dma.done.wait [#allocation4], 128  }
 0x1ca   :  { %617 = vsyncadd [#allocation4], 4294967168 }
 0x1cb   :  { %356 = vsyncpa [#allocation3], 1 }
 0x1cc   :  { %357 = vsyncpa [#allocation6], 1 }
 0x1cd   :  { %358 = vsyncpa [#allocation9], 1 }
 0x1ce   :  { %359 = vsyncpa [#allocation4], 1 }

</bundles_post_ra>
